<compile_context>
chip_gen: v7x
topology: tpu7x:2x2x1
jax: 0.10.0
libtpu: 0.0.40
codegen_flags: <defaults>
</compile_context>

<pallas_src>
import functools

import jax
import jax.numpy as jnp
from jax.experimental import pallas as pl
from jax.experimental.pallas import tpu as pltpu

HIDDEN = 256
LANE = 128


def _round_up(x, m):
    return ((x + m - 1) // m) * m


def qnet_kernel(x_ref, w1_ref, b1_ref, w2_ref, b2_ref, w3_ref, b3_ref, out_ref):
    # fc1 + ReLU: x block arrives already bf16; MXU accumulates in f32,
    # elementwise kept in f32 (v5e-safe).
    h1 = jnp.dot(x_ref[...], w1_ref[...], preferred_element_type=jnp.float32)
    h1 = jnp.maximum(h1 + b1_ref[...], 0.0)
    # fc2 + ReLU (256x256 -> perfect MXU tile)
    h2 = jnp.dot(h1.astype(jnp.bfloat16), w2_ref[...],
                 preferred_element_type=jnp.float32)
    h2 = jnp.maximum(h2 + b2_ref[...], 0.0)
    # fc3 (no activation), lane-dense (n_actions padded to 128) store
    h3 = jnp.dot(h2.astype(jnp.bfloat16), w3_ref[...],
                 preferred_element_type=jnp.float32)
    out_ref[...] = (h3 + b3_ref[...]).astype(out_ref.dtype)


@functools.partial(jax.jit, static_argnames=("n_actions",))
def qnetwork_forward(x, params, *, n_actions):
    """x: (B, obs_dim) float32. params: pre-cast bf16 weights, pre-padded fc3."""
    w1, w2, w3p = params["w1"], params["w2"], params["w3p"]   # bf16, (in, out)
    b1, b2, b3p = params["b1"], params["b2"], params["b3p"]   # f32,  (1, out)

    B, obs_dim = x.shape
    n_pad = w3p.shape[1]

    # Batch-adaptive tile: small batches -> one >=8-row block (latency path),
    # large batches -> 256-row tiles (v5e cap; >=2 grid steps once B > 256 so
    # the "parallel" axis can shard across v7x's two TensorCores).
    if B <= 256:
        tb = max(8, _round_up(B, 8))
    else:
        tb = 256
    b_pad = _round_up(B, tb)
    grid = (b_pad // tb,)

    # Stream x as bf16 (half the DMA bytes, no in-kernel convert).
    x_p = jnp.pad(x.astype(jnp.bfloat16), ((0, b_pad - B), (0, 0)))

    # Weights/biases stay VMEM-resident across grid steps (index_map -> block 0).
    # NOTE: could be single-buffered on v7x (64 MiB VMEM) once obs_dim grows;
    # for these shapes default double-buffering is negligible.
    resident = lambda shape: pl.BlockSpec(shape, lambda i: (0,) * len(shape))

    # Right-size the VMEM request from the actual block footprint (+headroom).
    w_bytes = (obs_dim * HIDDEN + HIDDEN * HIDDEN + HIDDEN * n_pad) * 2   # bf16
    b_bytes = (HIDDEN + HIDDEN + n_pad) * 4
    io_bytes = 2 * tb * obs_dim * 2 + 2 * tb * n_pad * 4   # double-buffered x/out
    act_bytes = 3 * tb * HIDDEN * 4 + tb * n_pad * 4       # in-kernel intermediates
    vmem_limit = int(min(max(2 * (w_bytes + b_bytes) + io_bytes + 2 * act_bytes,
                             8 << 20), 32 << 20))

    flops = 2 * b_pad * (obs_dim * HIDDEN + HIDDEN * HIDDEN + HIDDEN * n_pad)
    bytes_accessed = x_p.size * 2 + w_bytes + b_bytes + b_pad * n_pad * 4

    out_padded = pl.pallas_call(
        qnet_kernel,
        out_shape=jax.ShapeDtypeStruct((b_pad, n_pad), jnp.float32),
        grid=grid,
        in_specs=[
            pl.BlockSpec((tb, obs_dim), lambda i: (i, 0)),   # x: batch-tiled
            resident(w1.shape), resident(b1.shape),
            resident(w2.shape), resident(b2.shape),
            resident(w3p.shape), resident(b3p.shape),
        ],
        out_specs=pl.BlockSpec((tb, n_pad), lambda i: (i, 0)),
        compiler_params=pltpu.CompilerParams(
            dimension_semantics=("parallel",),
            vmem_limit_bytes=vmem_limit,
        ),
        cost_estimate=pl.CostEstimate(
            flops=flops, transcendentals=0, bytes_accessed=bytes_accessed),
    )(x_p, w1, b1, w2, b2, w3p, b3p)

    return out_padded[:B, :n_actions]


def init_params(key, obs_dim, n_actions):
    """nn.Linear-style init (uniform +/- 1/sqrt(fan_in)). Weights stored as
    (in, out) = PyTorch weight.T, pre-cast to bf16; fc3 weight/bias pre-padded
    to a lane-dense 128 multiple so the per-call wrapper does no casts/pads."""
    ks = jax.random.split(key, 6)

    def linear(kw, kb, fan_in, fan_out):
        bound = 1.0 / jnp.sqrt(jnp.float32(fan_in))
        w = jax.random.uniform(kw, (fan_in, fan_out), jnp.float32, -bound, bound)
        b = jax.random.uniform(kb, (1, fan_out), jnp.float32, -bound, bound)
        return w, b

    w1, b1 = linear(ks[0], ks[1], obs_dim, HIDDEN)
    w2, b2 = linear(ks[2], ks[3], HIDDEN, HIDDEN)
    w3, b3 = linear(ks[4], ks[5], HIDDEN, n_actions)

    n_pad = _round_up(n_actions, LANE)
    w3p = jnp.pad(w3, ((0, 0), (0, n_pad - n_actions)))
    b3p = jnp.pad(b3, ((0, 0), (0, n_pad - n_actions)))

    return {
        "w1": w1.astype(jnp.bfloat16), "b1": b1,
        "w2": w2.astype(jnp.bfloat16), "b2": b2,
        "w3p": w3p.astype(jnp.bfloat16), "b3p": b3p,
    }


def reference_forward(x, p, n_actions):
    """Pure-JAX reference with the same bf16-operand / f32-accumulate recipe."""
    bf = jnp.bfloat16
    h1 = jnp.dot(x.astype(bf), p["w1"], preferred_element_type=jnp.float32) + p["b1"]
    h1 = jnp.maximum(h1, 0.0)
    h2 = jnp.dot(h1.astype(bf), p["w2"], preferred_element_type=jnp.float32) + p["b2"]
    h2 = jnp.maximum(h2, 0.0)
    h3 = jnp.dot(h2.astype(bf), p["w3p"], preferred_element_type=jnp.float32) + p["b3p"]
    return h3[:, :n_actions]


if __name__ == "__main__":
    key = jax.random.PRNGKey(0)
    k_x, k_p = jax.random.split(key)

    batch, obs_dim, n_actions = 2, 8, 4   # CartPole-like small env
    x = jax.random.normal(k_x, (batch, obs_dim), jnp.float32)
    params = init_params(k_p, obs_dim, n_actions)

    out = jax.block_until_ready(qnetwork_forward(x, params, n_actions=n_actions))
    ref = reference_forward(x, params, n_actions)

    assert out.shape == (batch, n_actions), out.shape
    assert jnp.allclose(out, ref, atol=2e-2, rtol=2e-2), "mismatch vs reference"

    print("KERNEL_OK")
</pallas_src>

<mosaic_0001>
module attributes {stable_mosaic.version = 11 : i64} {
  func.func @qnet_kernel(%arg0: i32, %arg1: memref<8x8xbf16, #tpu.memory_space<vmem>>, %arg2: memref<8x256xbf16, #tpu.memory_space<vmem>>, %arg3: memref<1x256xf32, #tpu.memory_space<vmem>>, %arg4: memref<256x256xbf16, #tpu.memory_space<vmem>>, %arg5: memref<1x256xf32, #tpu.memory_space<vmem>>, %arg6: memref<256x128xbf16, #tpu.memory_space<vmem>>, %arg7: memref<1x128xf32, #tpu.memory_space<vmem>>, %arg8: memref<8x128xf32, #tpu.memory_space<vmem>>) attributes {dimension_semantics = [#tpu.dimension_semantics<parallel>], iteration_bounds = array<i64: 1>, scalar_prefetch = 0 : i64, scratch_operands = 0 : i64, tpu.core_type = #tpu.core_type<tc>, window_params = [{transform_indices = @transform_0, window_bounds = array<i64: 8, 8>}, {pipeline_mode = #tpu.pipeline_mode<synchronous>, transform_indices = @transform_1, window_bounds = array<i64: 8, 256>}, {pipeline_mode = #tpu.pipeline_mode<synchronous>, transform_indices = @transform_2, window_bounds = array<i64: 1, 256>}, {pipeline_mode = #tpu.pipeline_mode<synchronous>, transform_indices = @transform_3, window_bounds = array<i64: 256, 256>}, {pipeline_mode = #tpu.pipeline_mode<synchronous>, transform_indices = @transform_4, window_bounds = array<i64: 1, 256>}, {pipeline_mode = #tpu.pipeline_mode<synchronous>, transform_indices = @transform_5, window_bounds = array<i64: 256, 128>}, {pipeline_mode = #tpu.pipeline_mode<synchronous>, transform_indices = @transform_6, window_bounds = array<i64: 1, 128>}, {transform_indices = @transform_7, window_bounds = array<i64: 8, 128>}]} {
    %c0 = arith.constant 0 : index
    %c0_0 = arith.constant 0 : index
    %0 = vector.load %arg1[%c0, %c0_0] : memref<8x8xbf16, #tpu.memory_space<vmem>>, vector<8x8xbf16>
    %c0_1 = arith.constant 0 : index
    %c0_2 = arith.constant 0 : index
    %1 = vector.load %arg2[%c0_1, %c0_2] : memref<8x256xbf16, #tpu.memory_space<vmem>>, vector<8x256xbf16>
    %cst = arith.constant dense<0.000000e+00> : vector<8x256xf32>
    %2 = tpu.matmul %0, %1, %cst {dimension_numbers = #tpu.dot_dimension_numbers<[1], [0], [0], [1], [0, 0, 1, 1], [], []>} : vector<8x8xbf16>, vector<8x256xbf16>, vector<8x256xf32> -> vector<8x256xf32>
    %c0_3 = arith.constant 0 : index
    %c0_4 = arith.constant 0 : index
    %3 = vector.load %arg3[%c0_3, %c0_4] : memref<1x256xf32, #tpu.memory_space<vmem>>, vector<1x256xf32>
    %4 = vector.broadcast %3 : vector<1x256xf32> to vector<8x256xf32>
    %5 = arith.addf %2, %4 : vector<8x256xf32>
    %cst_5 = arith.constant 0.000000e+00 : f32
    %6 = vector.broadcast %cst_5 : f32 to vector<8x256xf32>
    %7 = arith.maximumf %5, %6 : vector<8x256xf32>
    %8 = arith.truncf %7 : vector<8x256xf32> to vector<8x256xbf16>
    %c0_6 = arith.constant 0 : index
    %c0_7 = arith.constant 0 : index
    %9 = vector.load %arg4[%c0_6, %c0_7] : memref<256x256xbf16, #tpu.memory_space<vmem>>, vector<256x256xbf16>
    %cst_8 = arith.constant dense<0.000000e+00> : vector<8x256xf32>
    %10 = tpu.matmul %8, %9, %cst_8 {dimension_numbers = #tpu.dot_dimension_numbers<[1], [0], [0], [1], [0, 0, 1, 1], [], []>} : vector<8x256xbf16>, vector<256x256xbf16>, vector<8x256xf32> -> vector<8x256xf32>
    %c0_9 = arith.constant 0 : index
    %c0_10 = arith.constant 0 : index
    %11 = vector.load %arg5[%c0_9, %c0_10] : memref<1x256xf32, #tpu.memory_space<vmem>>, vector<1x256xf32>
    %12 = vector.broadcast %11 : vector<1x256xf32> to vector<8x256xf32>
    %13 = arith.addf %10, %12 : vector<8x256xf32>
    %cst_11 = arith.constant 0.000000e+00 : f32
    %14 = vector.broadcast %cst_11 : f32 to vector<8x256xf32>
    %15 = arith.maximumf %13, %14 : vector<8x256xf32>
    %16 = arith.truncf %15 : vector<8x256xf32> to vector<8x256xbf16>
    %c0_12 = arith.constant 0 : index
    %c0_13 = arith.constant 0 : index
    %17 = vector.load %arg6[%c0_12, %c0_13] : memref<256x128xbf16, #tpu.memory_space<vmem>>, vector<256x128xbf16>
    %cst_14 = arith.constant dense<0.000000e+00> : vector<8x128xf32>
    %18 = tpu.matmul %16, %17, %cst_14 {dimension_numbers = #tpu.dot_dimension_numbers<[1], [0], [0], [1], [0, 0, 1, 1], [], []>} : vector<8x256xbf16>, vector<256x128xbf16>, vector<8x128xf32> -> vector<8x128xf32>
    %c0_15 = arith.constant 0 : index
    %c0_16 = arith.constant 0 : index
    %19 = vector.load %arg7[%c0_15, %c0_16] : memref<1x128xf32, #tpu.memory_space<vmem>>, vector<1x128xf32>
    %20 = vector.broadcast %19 : vector<1x128xf32> to vector<8x128xf32>
    %21 = arith.addf %18, %20 : vector<8x128xf32>
    %c0_17 = arith.constant 0 : index
    %c0_18 = arith.constant 0 : index
    %22 = vector.load %arg8[%c0_17, %c0_18] : memref<8x128xf32, #tpu.memory_space<vmem>>, vector<8x128xf32>
    tpu.vector_store %arg8[%c0_17, %c0_18], %21 {strides = array<i32>} : memref<8x128xf32, #tpu.memory_space<vmem>>, vector<8x128xf32>,
    return
  }
  func.func @transform_0(%arg0: i32) -> (i32, i32) {
    %c0_i32 = arith.constant 0 : i32
    %c0_i32_0 = arith.constant 0 : i32
    return %arg0, %c0_i32 : i32, i32
  }
  func.func @transform_1(%arg0: i32) -> (i32, i32) {
    %c0_i32 = arith.constant 0 : i32
    %c0_i32_0 = arith.constant 0 : i32
    %c0_i32_1 = arith.constant 0 : i32
    return %c0_i32, %c0_i32_0 : i32, i32
  }
  func.func @transform_2(%arg0: i32) -> (i32, i32) {
    %c0_i32 = arith.constant 0 : i32
    %c0_i32_0 = arith.constant 0 : i32
    %c0_i32_1 = arith.constant 0 : i32
    return %c0_i32, %c0_i32_0 : i32, i32
  }
  func.func @transform_3(%arg0: i32) -> (i32, i32) {
    %c0_i32 = arith.constant 0 : i32
    %c0_i32_0 = arith.constant 0 : i32
    %c0_i32_1 = arith.constant 0 : i32
    return %c0_i32, %c0_i32_0 : i32, i32
  }
  func.func @transform_4(%arg0: i32) -> (i32, i32) {
    %c0_i32 = arith.constant 0 : i32
    %c0_i32_0 = arith.constant 0 : i32
    %c0_i32_1 = arith.constant 0 : i32
    return %c0_i32, %c0_i32_0 : i32, i32
  }
  func.func @transform_5(%arg0: i32) -> (i32, i32) {
    %c0_i32 = arith.constant 0 : i32
    %c0_i32_0 = arith.constant 0 : i32
    %c0_i32_1 = arith.constant 0 : i32
    return %c0_i32, %c0_i32_0 : i32, i32
  }
  func.func @transform_6(%arg0: i32) -> (i32, i32) {
    %c0_i32 = arith.constant 0 : i32
    %c0_i32_0 = arith.constant 0 : i32
    %c0_i32_1 = arith.constant 0 : i32
    return %c0_i32, %c0_i32_0 : i32, i32
  }
  func.func @transform_7(%arg0: i32) -> (i32, i32) {
    %c0_i32 = arith.constant 0 : i32
    %c0_i32_0 = arith.constant 0 : i32
    return %arg0, %c0_i32 : i32, i32
  }
}

</mosaic_0001>

<bundles_post_ra>
// kernel: qnetwork_forward.1
= control target key start
LH: loop header
LB: loop body
LE: loop exit
PB: predicated region body
PF: predicated region fallthrough
CT: control target
= control target key end

     0   :  { %12 = vsyncpa [#allocation3], 0  ;;  %s846_s0 = inlined_call_operand.vmem [shape: bf16[8,8], index: 0, kind: input, shape index: {}]   ;;  %s847_s1 = inlined_call_operand.vmem [shape: bf16[8,256], index: 1, kind: input, shape index: {}]   ;;  %s848_s2 = inlined_call_operand.vmem [shape: f32[1,256], index: 2, kind: input, shape index: {}]   ;;  %s849_s3 = inlined_call_operand.hbm [shape: bf16[256,256], index: 3, kind: input, shape index: {}]   ;;  %s850_s4 = inlined_call_operand.vmem [shape: f32[1,256], index: 4, kind: input, shape index: {}]   ;;  %s851_s5 = inlined_call_operand.hbm [shape: bf16[256,128], index: 5, kind: input, shape index: {}]   ;;  %s852_s6 = inlined_call_operand.vmem [shape: f32[1,128], index: 6, kind: input, shape index: {}]   ;;  %s853_s7 = inlined_call_operand.vmem [shape: f32[8,128], index: 7, kind: output, shape index: {}]  }
   0x1   :  { %13 = vsyncpa [#allocation5], 0  ;;  %s757_s24 = smov [#allocation2]   ;;  %s709_s28 = scalar_lea.hbm %s849_s3, 4096 }
   0x2   :  { %s25_s25 = sshll.u32 %s757_s24, 4  ;;  %p710_p0 = scmp.ne.s32.totalorder %s849_s3, %s709_s28  ;;  %s26_s25 = int_to_ptr.vmem [resolvable:$true] %s25_s25 }
   0x3   :  { %p713_p1 = scmp.lt.u32.totalorder %s709_s28, %s849_s3 }
   0x5   :  { %p715_p2 = pnand %p713_p1, %p710_p0 }
   0x7   :  { %718 = shalt.err (!%p715_p2)
}
   0x8   :  { %s719_s10 = scalar_lea.vmem %s26_s25, 4096  ;;  %p724_p4 = scmp.lt.s32.totalorder %s26_s25, %s26_s25 }
   0x9   :  { %p720_p3 = scmp.ne.s32.totalorder %s26_s25, %s719_s10  ;;  %p725_p5 = scmp.lt.s32.totalorder %s719_s10, %s719_s10 }
   0xb   :  { %p726_p6 = por %p725_p5, %p724_p4 }
   0xd   :  { %p727_p7 = pnand %p726_p6, %p720_p3 }
   0xf   :  { %730 = shalt.err (!%p727_p7)
}
  0x10   :  { %s758_s11 = smov 128   ;;  %s759_s12 = smov 8  }
  0x11   :  { %31 = dma.hbm_to_vmem [thread:$0]  %s849_s3, 4096, %s26_s25, [#allocation3], %s758_s11, %s758_s11, %s759_s12  }
  0x12   :  { %s760_s15 = smov [#allocation4]   ;;  %s731_s19 = scalar_lea.hbm %s851_s5, 2048 }
  0x13   :  { %s39_s16 = sshll.u32 %s760_s15, 4  ;;  %p732_p8 = scmp.ne.s32.totalorder %s851_s5, %s731_s19  ;;  %s40_s16 = int_to_ptr.vmem [resolvable:$true] %s39_s16 }
  0x14   :  { %p735_p9 = scmp.lt.u32.totalorder %s731_s19, %s851_s5 }
  0x16   :  { %p737_p10 = pnand %p735_p9, %p732_p8 }
  0x18   :  { %740 = shalt.err (!%p737_p10)
}
  0x19   :  { %s741_s24 = scalar_lea.vmem %s40_s16, 2048  ;;  %p746_p12 = scmp.lt.s32.totalorder %s40_s16, %s40_s16 }
  0x1a   :  { %p742_p11 = scmp.ne.s32.totalorder %s40_s16, %s741_s24  ;;  %p747_p13 = scmp.lt.s32.totalorder %s741_s24, %s741_s24 }
  0x1c   :  { %p748_p0 = por %p747_p13, %p746_p12 }
  0x1e   :  { %p749_p1 = pnand %p748_p0, %p742_p11 }
  0x20   :  { %752 = shalt.err (!%p749_p1)
}
  0x21   :  { %s761_s3 = smov 64   ;;  %s762_s25 = smov 4  }
  0x22   :  { %45 = dma.hbm_to_vmem [thread:$0]  %s851_s5, 2048, %s40_s16, [#allocation5], %s761_s3, %s761_s3, %s762_s25  }
  0x23   :  { %753 = dma.done.wait [#allocation3], 4096  }
  0x24   :  { %754 = vsyncadd [#allocation3], 4294963200 }
  0x25   :  { %755 = dma.done.wait [#allocation5], 2048  }
  0x26   :  { %756 = vsyncadd [#allocation5], 4294965248  ;;  %v763_v0 = vmov 0   ;;  %v56_v1 = vld [vmem:[%s847_s1] sm:$0xff]  ;;  %vm78_vm0 = vcmask 1043456   ;;  %vm74_vm1 = vcmask 64512   ;;  %v59_v50 = vlaneseq }
  0x27   :  { %117 = vmatprep.mubr.bf16.mxu0 %v763_v0  ;;  %v562_v2 = vcombine.high %v56_v1, %v56_v1  ;;  %v561_v3 = vcombine.low %v56_v1, %v56_v1  ;;  %v645_v4 = vld [vmem:[#allocation2 + $0x4] ss:$8 sps:$4 sm:$0xff]   ;;  %v647_v5 = vld [vmem:[#allocation2] ss:$8 sps:$4 sm:$0xff]   ;;  %v648_v6 = vld [vmem:[#allocation2 + $0x14] ss:$8 sps:$4 sm:$0xff]  }
  0x28   :  { %334 = vmatprep.subr.bf16.mxu1 %v645_v4  ;;  %v55_v8 = vld [vmem:[%s846_s0] sm:$0xf]  ;;  %v651_v10 = vld [vmem:[#allocation2 + $0x24] ss:$8 sps:$4 sm:$0xff]   ;;  %v653_v11 = vld [vmem:[#allocation2 + $0x20] ss:$8 sps:$4 sm:$0xff]  }
  0x29   :  { %563 = vmatprep.subr.msk.bf16.mxu0 %vm78_vm0, %v562_v2  ;;  %v80_v7 = vsel %vm78_vm0, %v561_v3, 0  ;;  %335 = vmatpush1.bf16.msra.mxu1 %v647_v5  ;;  %v650_v9 = vld [vmem:[#allocation2 + $0x10] ss:$8 sps:$4 sm:$0xff]   ;;  %v654_v12 = vld [vmem:[#allocation2 + $0x34] ss:$8 sps:$4 sm:$0xff]   ;;  %v693_v38 = vld [vmem:[#allocation4 + $0x40] sm:$0xff]  }
  0x2a   :  { %86 = vmatpush1.bf16.msra.mxu0 %v80_v7  ;;  %336 = vmatprep.subr.bf16.mxu1 %v648_v6  ;;  %v656_v13 = vld [vmem:[#allocation2 + $0x30] ss:$8 sps:$4 sm:$0xff]   ;;  %v657_v14 = vld [vmem:[#allocation2 + $0x44] ss:$8 sps:$4 sm:$0xff]   ;;  %v659_v15 = vld [vmem:[#allocation2 + $0x40] ss:$8 sps:$4 sm:$0xff]  }
  0x2b   :  { %v660_v16 = vld [vmem:[#allocation2 + $0x54] ss:$8 sps:$4 sm:$0xff]   ;;  %v662_v17 = vld [vmem:[#allocation2 + $0x50] ss:$8 sps:$4 sm:$0xff]   ;;  %v663_v18 = vld [vmem:[#allocation2 + $0x64] ss:$8 sps:$4 sm:$0xff]   ;;  %614 = vmatprep.subr.bf16.mxu0 %v693_v38 }
  0x2c   :  { %v665_v19 = vld [vmem:[#allocation2 + $0x60] ss:$8 sps:$4 sm:$0xff]   ;;  %v666_v20 = vld [vmem:[#allocation2 + $0x74] ss:$8 sps:$4 sm:$0xff]   ;;  %v668_v21 = vld [vmem:[#allocation2 + $0x70] ss:$8 sps:$4 sm:$0xff]  }
  0x2d   :  { %564 = vmatmul.mubr.msk.bf16.vlgmr.msra.gmra.mrb[0].mxu0 %vm74_vm1, %v55_v8  ;;  %337 = vmatpush1.bf16.msra.mxu1 %v650_v9  ;;  %v669_v22 = vld [vmem:[#allocation2 + $0x84] ss:$8 sps:$4 sm:$0xff]   ;;  %v671_v23 = vld [vmem:[#allocation2 + $0x80] ss:$8 sps:$4 sm:$0xff]   ;;  %v672_v24 = vld [vmem:[#allocation2 + $0x94] ss:$8 sps:$4 sm:$0xff]  }
  0x2e   :  { %338 = vmatprep.subr.bf16.mxu1 %v651_v10  ;;  %v674_v25 = vld [vmem:[#allocation2 + $0x90] ss:$8 sps:$4 sm:$0xff]   ;;  %v675_v26 = vld [vmem:[#allocation2 + $0xa4] ss:$8 sps:$4 sm:$0xff]   ;;  %v677_v27 = vld [vmem:[#allocation2 + $0xa0] ss:$8 sps:$4 sm:$0xff]  }
  0x2f   :  { %v678_v28 = vld [vmem:[#allocation2 + $0xb4] ss:$8 sps:$4 sm:$0xff]   ;;  %v680_v29 = vld [vmem:[#allocation2 + $0xb0] ss:$8 sps:$4 sm:$0xff]   ;;  %v681_v30 = vld [vmem:[#allocation2 + $0xc4] ss:$8 sps:$4 sm:$0xff]  }
  0x30   :  { %v683_v31 = vld [vmem:[#allocation2 + $0xc0] ss:$8 sps:$4 sm:$0xff]   ;;  %v684_v32 = vld [vmem:[#allocation2 + $0xd4] ss:$8 sps:$4 sm:$0xff]   ;;  %v686_v33 = vld [vmem:[#allocation2 + $0xd0] ss:$8 sps:$4 sm:$0xff]  }
  0x31   :  { %339 = vmatpush1.bf16.msra.mxu1 %v653_v11  ;;  %v687_v34 = vld [vmem:[#allocation2 + $0xe4] ss:$8 sps:$4 sm:$0xff]   ;;  %v689_v35 = vld [vmem:[#allocation2 + $0xe0] ss:$8 sps:$4 sm:$0xff]   ;;  %v690_v36 = vld [vmem:[#allocation2 + $0xf4] ss:$8 sps:$4 sm:$0xff]  }
  0x32   :  { %340 = vmatprep.subr.bf16.mxu1 %v654_v12  ;;  %v692_v37 = vld [vmem:[#allocation2 + $0xf0] ss:$8 sps:$4 sm:$0xff]   ;;  %v694_v39 = vld [vmem:[#allocation4] sm:$0xff]   ;;  %v695_v40 = vld [vmem:[#allocation4 + $0x48] sm:$0xff]   ;;  %v60_v51 = vshrl.u32 %v59_v50, 7 }
  0x33   :  { %615 = vmatpush3.bf16.msra.mxu0 %v694_v39  ;;  %v696_v41 = vld [vmem:[#allocation4 + $0x8] sm:$0xff]   ;;  %v697_v42 = vld [vmem:[#allocation4 + $0x50] sm:$0xff]   ;;  %v699_v44 = vld [vmem:[#allocation4 + $0x58] sm:$0xff]  }
  0x34   :  { %616 = vmatprep.subr.bf16.mxu0 %v695_v40  ;;  %v698_v43 = vld [vmem:[#allocation4 + $0x10] sm:$0xff]   ;;  %v700_v45 = vld [vmem:[#allocation4 + $0x18] sm:$0xff]   ;;  %v701_v46 = vld [vmem:[#allocation4 + $0x60] sm:$0xff]   ;;  %v61_v52 = vsub.s32 0, %v60_v51  ;;  %v65_v54 = vsub.s32 1, %v60_v51 }
  0x35   :  { %341 = vmatpush1.bf16.msra.mxu1 %v656_v13  ;;  %v702_v47 = vld [vmem:[#allocation4 + $0x20] sm:$0xff]   ;;  %v703_v48 = vld [vmem:[#allocation4 + $0x68] sm:$0xff]   ;;  %v57_v53 = vld [vmem:[%s848_s2] sm:$0x3] }
  0x36   :  { %342 = vmatprep.subr.bf16.mxu1 %v657_v14  ;;  %v704_v49 = vld [vmem:[#allocation4 + $0x28] sm:$0xff]   ;;  %v62_v55 = vrot.slane %v57_v53, %v61_v52  ;;  %v66_v56 = vrot.slane %v57_v53, %v65_v54  ;;  %v705_v3 = vld [vmem:[#allocation4 + $0x70] sm:$0xff]   ;;  %v707_v5 = vld [vmem:[#allocation4 + $0x78] sm:$0xff]  }
  0x37   :  { %617 = vmatpush3.bf16.msra.mxu0 %v696_v41  ;;  %v706_v4 = vld [vmem:[#allocation4 + $0x30] sm:$0xff]   ;;  %v708_v6 = vld [vmem:[#allocation4 + $0x38] sm:$0xff]  }
  0x38   :  { %618 = vmatprep.subr.bf16.mxu0 %v697_v42  ;;  %v162_v7 = vld [vmem:[%s850_s4] sm:$0x3] }
  0x39   :  { %343 = vmatpush1.bf16.msra.mxu1 %v659_v15  ;;  %v167_v8 = vrot.slane %v162_v7, %v61_v52  ;;  %v171_v9 = vrot.slane %v162_v7, %v65_v54 }
  0x3a   :  { %344 = vmatprep.subr.bf16.mxu1 %v660_v16 }
  0x3b   :  { %619 = vmatpush3.bf16.msra.mxu0 %v698_v43 }
  0x3c   :  { %620 = vmatprep.subr.bf16.mxu0 %v699_v44 }
  0x3d   :  { %345 = vmatpush1.bf16.msra.mxu1 %v662_v17 }
  0x3e   :  { %346 = vmatprep.subr.bf16.mxu1 %v663_v18 }
  0x3f   :  { %621 = vmatpush3.bf16.msra.mxu0 %v700_v45 }
  0x40   :  { %622 = vmatprep.subr.bf16.mxu0 %v701_v46 }
  0x41   :  { %347 = vmatpush1.bf16.msra.mxu1 %v665_v19 }
  0x42   :  { %348 = vmatprep.subr.bf16.mxu1 %v666_v20 }
  0x43   :  { %623 = vmatpush3.bf16.msra.mxu0 %v702_v47 }
  0x44   :  { %624 = vmatprep.subr.bf16.mxu0 %v703_v48 }
  0x45   :  { %349 = vmatpush1.bf16.msra.mxu1 %v668_v21  ;;  %v597_v21 = vld [vmem:[%s852_s6] ss:$0 sm:$0xff] }
  0x46   :  { %350 = vmatprep.subr.bf16.mxu1 %v669_v22 }
  0x47   :  { %625 = vmatpush3.bf16.msra.mxu0 %v704_v49 }
  0x48   :  { %626 = vmatprep.subr.bf16.mxu0 %v705_v3 }
  0x49   :  { %351 = vmatpush1.bf16.msra.mxu1 %v671_v23 }
  0x4a   :  { %352 = vmatprep.subr.bf16.mxu1 %v672_v24 }
  0x4b   :  { %627 = vmatpush3.bf16.msra.mxu0 %v706_v4 }
  0x4c   :  { %628 = vmatprep.subr.bf16.mxu0 %v707_v5 }
  0x4d   :  { %353 = vmatpush1.bf16.msra.mxu1 %v674_v25 }
  0x4e   :  { %354 = vmatprep.subr.bf16.mxu1 %v675_v26 }
  0x4f   :  { %629 = vmatpush3.bf16.msra.mxu0 %v708_v6 }
  0x51   :  { %355 = vmatpush1.bf16.msra.mxu1 %v677_v27 }
  0x52   :  { %356 = vmatprep.subr.bf16.mxu1 %v678_v28 }
  0x55   :  { %357 = vmatpush1.bf16.msra.mxu1 %v680_v29 }
  0x56   :  { %358 = vmatprep.subr.bf16.mxu1 %v681_v30 }
  0x59   :  { %359 = vmatpush1.bf16.msra.mxu1 %v683_v31 }
  0x5a   :  { %360 = vmatprep.subr.bf16.mxu1 %v684_v32 }
  0x5d   :  { %361 = vmatpush1.bf16.msra.mxu1 %v686_v33 }
  0x5e   :  { %362 = vmatprep.subr.bf16.mxu1 %v687_v34 }
  0x61   :  { %363 = vmatpush1.bf16.msra.mxu1 %v689_v35 }
  0x62   :  { %364 = vmatprep.subr.bf16.mxu1 %v690_v36 }
  0x65   :  { %365 = vmatpush1.bf16.msra.mxu1 %v692_v37 }
 0x100   :  { %v119_v57 = vpop.f32.mrb[0].mxu0 }
 0x101   :  { %v120_v58 = vadd.f32 %v119_v57, %v62_v55  ;;  %v121_v59 = vpop.f32.mrb[1].mxu0 }
 0x102   :  { %v122_v60 = vadd.f32 %v121_v59, %v66_v56  ;;  %v123_v61 = vpop.f32.mrb[2].mxu0 }
 0x103   :  { %v126_v62 = vmax.f32 %v120_v58, 0.0  ;;  %v124_v63 = vpop.f32.mrb[3].mxu0 }
 0x104   :  { %v127_v0 = vmax.f32 %v122_v60, 0.0 }
 0x105   :  { %v128_v2 = vpack.c.bf16 %v126_v62, %v126_v62 }
 0x106   :  { %v129_v1 = vpack.c.bf16 %v127_v0, %v127_v0 }
 0x108   :  { %366 = vmatprep.mubr.bf16.mxu1 %v129_v1 }
 0x109   :  { %367 = vmatmul.mubr.bf16.vlgmr.msra.gmra.mrb[0].mxu1 %v128_v2 }
 0x1dc   :  { %v368_v10 = vpop.f32.mrb[0].mxu1 }
 0x1dd   :  { %v369_v11 = vadd.f32 %v368_v10, %v167_v8  ;;  %v370_v12 = vpop.f32.mrb[1].mxu1 }
 0x1de   :  { %v371_v13 = vadd.f32 %v370_v12, %v171_v9  ;;  %v372_v14 = vpop.f32.mrb[2].mxu1 }
 0x1df   :  { %v375_v15 = vmax.f32 %v369_v11, 0.0  ;;  %v373_v16 = vpop.f32.mrb[3].mxu1 }
 0x1e0   :  { %v376_v17 = vmax.f32 %v371_v13, 0.0 }
 0x1e1   :  { %v377_v19 = vpack.c.bf16 %v375_v15, %v375_v15 }
 0x1e2   :  { %v378_v18 = vpack.c.bf16 %v376_v17, %v376_v17 }
 0x1e4   :  { %546 = vmatprep.mubr.bf16.mxu0 %v378_v18 }
 0x1e5   :  { %547 = vmatmul.mubr.bf16.vlgmr.msra.gmra.mrb[4].mxu0 %v377_v19 }
 0x2b8   :  { %v630_v20 = vpop.f32.mrb[4].mxu0 }
 0x2b9   :  { %v631_v22 = vpop.f32.mrb[5].mxu0 }
 0x2ba   :  { %v632_v23 = vadd.f32 %v631_v22, %v630_v20  ;;  %v633_v24 = vpop.f32.mrb[6].mxu0 }
 0x2bb   :  { %v634_v25 = vpop.f32.mrb[7].mxu0 }
 0x2bc   :  { %v549_v26 = vadd.f32 %v632_v23, %v597_v21 }
 0x2be   :  { %554 = vst [vmem:[%s853_s7] sm:$0xff] %v549_v26 }
 0x2bf   :  { %559 = vsyncpa [#allocation3], 1 }
 0x2c0   :  { %560 = vsyncpa [#allocation5], 1 }

</bundles_post_ra>
